<compile_context>
chip_gen: v7x
topology: tpu7x:2x2x1
jax: 0.10.0
libtpu: 0.0.40
codegen_flags: <defaults>
</compile_context>

<pallas_src>
import functools
import math

import jax
import jax.numpy as jnp
from jax.experimental import pallas as pl
from jax.experimental.pallas import tpu as pltpu


def _embed_gather_kernel(scale, ids_ref, tab_hbm, out_ref, row_buf, sem):
    # ids_ref : SMEM (N_pad,) int32   -- scalar-prefetched token ids
    # tab_hbm : HBM  (V, D)   f32     -- full embedding table (pl.ANY, no auto-DMA)
    # out_ref : VMEM (TM, D)  f32     -- this token-block's output tile
    # row_buf : VMEM (TM, D)  f32     -- DMA landing buffer for gathered rows
    # sem     : DMA semaphores, one per row in the block
    tm = out_ref.shape[0]
    base = pl.program_id(0) * tm

    # Issue all TM row DMAs back-to-back (they overlap in the DMA engine).
    @pl.loop(0, tm)
    def _issue(t):
        tok = ids_ref[base + t]
        pltpu.make_async_copy(tab_hbm.at[tok], row_buf.at[t], sem.at[t]).start()

    # Wait for all of them (descriptor shape is what matters for the wait).
    @pl.loop(0, tm)
    def _wait(t):
        pltpu.make_async_copy(tab_hbm.at[0], row_buf.at[t], sem.at[t]).wait()

    # Apply the sqrt(d_model) scale once, on the whole gathered tile, and do a
    # single unmasked lane-dense store.
    out_ref[...] = row_buf[...] * jnp.float32(scale)


def embeddings_forward(x_ids: jax.Array, table: jax.Array,
                       *, block_tokens: int = 8) -> jax.Array:
    """x_ids: (batch, seq) int; table: (vocab_size, d_model) f32.

    Returns (batch, seq, d_model) f32 == Embedding(x) * sqrt(d_model).
    """
    batch, seq = x_ids.shape
    vocab_size, d_model = table.shape
    n = batch * seq

    # Clamp ids so an out-of-range id cannot trigger an OOB HBM read.
    # TODO(synk): PyTorch nn.Embedding raises on out-of-range ids; we clamp instead.
    ids = jnp.clip(x_ids.reshape(n).astype(jnp.int32), 0, vocab_size - 1)

    # Pad the token count to a multiple of the block size; padded slots gather
    # row 0 and are sliced off below.
    n_pad = pl.cdiv(n, block_tokens) * block_tokens
    if n_pad != n:
        ids = jnp.pad(ids, (0, n_pad - n))
    num_blocks = n_pad // block_tokens

    table = table.astype(jnp.float32)
    scale = math.sqrt(d_model)

    out_flat = pl.pallas_call(
        functools.partial(_embed_gather_kernel, scale),
        out_shape=jax.ShapeDtypeStruct((n_pad, d_model), jnp.float32),
        grid_spec=pltpu.PrefetchScalarGridSpec(
            num_scalar_prefetch=1,              # ids -> SMEM
            grid=(num_blocks,),
            in_specs=[
                pl.BlockSpec(memory_space=pl.ANY),  # table stays in HBM
            ],
            out_specs=pl.BlockSpec(
                (block_tokens, d_model), lambda i, ids: (i, 0)),
            scratch_shapes=[
                pltpu.VMEM((block_tokens, d_model), jnp.float32),
                pltpu.SemaphoreType.DMA((block_tokens,)),
            ],
        ),
        compiler_params=pltpu.CompilerParams(
            dimension_semantics=("parallel",),      # split token blocks across TCs (v7x)
            vmem_limit_bytes=32 * 1024 * 1024,      # explicit, safe on v5e/v6e/v7x
        ),
    )(ids, table)

    return out_flat[:n].reshape(batch, seq, d_model)


if __name__ == "__main__":
    # Small deterministic setup consistent with the module's forward:
    #   x: (batch, seq) int token ids -> out: (batch, seq, d_model)
    vocab_size = 512
    d_model = 128          # multiple of 128 -> lane-dense output stores
    batch, seq = 2, 8

    key = jax.random.PRNGKey(0)
    k_tab, k_ids = jax.random.split(key)

    # nn.Embedding default init: N(0, 1)
    table = jax.random.normal(k_tab, (vocab_size, d_model), dtype=jnp.float32)
    x_ids = jax.random.randint(k_ids, (batch, seq), 0, vocab_size,
                               dtype=jnp.int32)

    out = embeddings_forward(x_ids, table)
    out = jax.block_until_ready(out)

    # Reference check against plain-JAX gather * sqrt(d_model)
    ref = table[x_ids] * jnp.float32(math.sqrt(d_model))
    assert out.shape == (batch, seq, d_model)
    assert jnp.allclose(out, ref, atol=1e-5, rtol=1e-5)

    print("KERNEL_OK")
</pallas_src>

<mosaic_0001>
module attributes {stable_mosaic.version = 11 : i64} {
  func.func @_embed_gather_kernel(%arg0: i32, %arg1: memref<16xi32, #tpu.memory_space<smem>>, %arg2: memref<512x128xf32, #tpu.memory_space<any>>, %arg3: memref<8x128xf32, #tpu.memory_space<vmem>>, %arg4: memref<8x128xf32, #tpu.memory_space<vmem>>, %arg5: memref<8x!tpu.dma_semaphore, #tpu.memory_space<semaphore_mem>>) attributes {dimension_semantics = [#tpu.dimension_semantics<parallel>], iteration_bounds = array<i64: 2>, scalar_prefetch = 1 : i64, scratch_operands = 2 : i64, tpu.core_type = #tpu.core_type<tc>, window_params = [{}, {transform_indices = @transform_1, window_bounds = array<i64: 8, 128>}]} {
    %c8_i32 = arith.constant 8 : i32
    %0 = arith.muli %arg0, %c8_i32 : i32
    %c0_i32 = arith.constant 0 : i32
    %c8_i32_0 = arith.constant 8 : i32
    %1 = arith.addi %c0_i32, %c8_i32_0 : i32
    %c1_i32 = arith.constant 1 : i32
    scf.for %arg6 = %c0_i32 to %1 step %c1_i32  : i32 {
      %c1_i32_9 = arith.constant 1 : i32
      %7 = arith.muli %arg6, %c1_i32_9 : i32
      %c0_i32_10 = arith.constant 0 : i32
      %8 = arith.addi %c0_i32_10, %7 : i32
      %9 = arith.addi %0, %8 : i32
      %10 = arith.index_cast %9 : i32 to index
      %11 = memref.load %arg1[%10] : memref<16xi32, #tpu.memory_space<smem>>
      %c0_i32_11 = arith.constant 0 : i32
      %12 = tpu.memref_slice %arg2[%11, %c0_i32_11] : memref<512x128xf32, #tpu.memory_space<any>> -> memref<1x128xf32, #tpu.memory_space<any>>
      %13 = tpu.memref_squeeze %12 : memref<1x128xf32, #tpu.memory_space<any>> -> memref<128xf32, #tpu.memory_space<any>>
      %c0_i32_12 = arith.constant 0 : i32
      %14 = tpu.memref_slice %arg4[%8, %c0_i32_12] : memref<8x128xf32, #tpu.memory_space<vmem>> -> memref<1x128xf32, #tpu.memory_space<vmem>>
      %15 = tpu.memref_squeeze %14 : memref<1x128xf32, #tpu.memory_space<vmem>> -> memref<128xf32, #tpu.memory_space<vmem>>
      %16 = tpu.memref_slice %arg5[%8] : memref<8x!tpu.dma_semaphore, #tpu.memory_space<semaphore_mem>> -> memref<1x!tpu.dma_semaphore, #tpu.memory_space<semaphore_mem>>
      %17 = tpu.memref_squeeze %16 : memref<1x!tpu.dma_semaphore, #tpu.memory_space<semaphore_mem>> -> memref<!tpu.dma_semaphore, #tpu.memory_space<semaphore_mem>>
      tpu.enqueue_dma source(%13 : memref<128xf32, #tpu.memory_space<any>>) target(%15 : memref<128xf32, #tpu.memory_space<vmem>>) target_semaphore(%17 : memref<!tpu.dma_semaphore, #tpu.memory_space<semaphore_mem>>)
    }
    %c8_i32_1 = arith.constant 8 : i32
    %c0_i32_2 = arith.constant 0 : i32
    %c8_i32_3 = arith.constant 8 : i32
    %2 = arith.addi %c0_i32_2, %c8_i32_3 : i32
    %c1_i32_4 = arith.constant 1 : i32
    scf.for %arg6 = %c0_i32_2 to %2 step %c1_i32_4  : i32 {
      %c1_i32_9 = arith.constant 1 : i32
      %7 = arith.muli %arg6, %c1_i32_9 : i32
      %c0_i32_10 = arith.constant 0 : i32
      %8 = arith.addi %c0_i32_10, %7 : i32
      %c0_i32_11 = arith.constant 0 : i32
      %c0_i32_12 = arith.constant 0 : i32
      %9 = tpu.memref_slice %arg2[%c0_i32_11, %c0_i32_12] : memref<512x128xf32, #tpu.memory_space<any>> -> memref<1x128xf32, #tpu.memory_space<any>>
      %10 = tpu.memref_squeeze %9 : memref<1x128xf32, #tpu.memory_space<any>> -> memref<128xf32, #tpu.memory_space<any>>
      %c0_i32_13 = arith.constant 0 : i32
      %11 = tpu.memref_slice %arg4[%8, %c0_i32_13] : memref<8x128xf32, #tpu.memory_space<vmem>> -> memref<1x128xf32, #tpu.memory_space<vmem>>
      %12 = tpu.memref_squeeze %11 : memref<1x128xf32, #tpu.memory_space<vmem>> -> memref<128xf32, #tpu.memory_space<vmem>>
      %13 = tpu.memref_slice %arg5[%8] : memref<8x!tpu.dma_semaphore, #tpu.memory_space<semaphore_mem>> -> memref<1x!tpu.dma_semaphore, #tpu.memory_space<semaphore_mem>>
      %14 = tpu.memref_squeeze %13 : memref<1x!tpu.dma_semaphore, #tpu.memory_space<semaphore_mem>> -> memref<!tpu.dma_semaphore, #tpu.memory_space<semaphore_mem>>
      tpu.wait_dma2 semaphore(%14 : memref<!tpu.dma_semaphore, #tpu.memory_space<semaphore_mem>>) src(%10 : memref<128xf32, #tpu.memory_space<any>>) dst(%12 : memref<128xf32, #tpu.memory_space<vmem>>)
    }
    %c8_i32_5 = arith.constant 8 : i32
    %c0 = arith.constant 0 : index
    %c0_6 = arith.constant 0 : index
    %3 = vector.load %arg4[%c0, %c0_6] : memref<8x128xf32, #tpu.memory_space<vmem>>, vector<8x128xf32>
    %cst = arith.constant 11.3137083 : f32
    %4 = vector.broadcast %cst : f32 to vector<8x128xf32>
    %5 = arith.mulf %3, %4 : vector<8x128xf32>
    %c0_7 = arith.constant 0 : index
    %c0_8 = arith.constant 0 : index
    %6 = vector.load %arg3[%c0_7, %c0_8] : memref<8x128xf32, #tpu.memory_space<vmem>>, vector<8x128xf32>
    tpu.vector_store %arg3[%c0_7, %c0_8], %5 {strides = array<i32>} : memref<8x128xf32, #tpu.memory_space<vmem>>, vector<8x128xf32>,
    return
  }
  func.func @transform_1(%arg0: i32, %arg1: memref<16xi32, #tpu.memory_space<smem>>) -> (i32, i32) {
    %c0_i32 = arith.constant 0 : i32
    %c0_i32_0 = arith.constant 0 : i32
    return %arg0, %c0_i32 : i32, i32
  }
}

</mosaic_0001>

<bundles_post_ra>
// kernel: tpu_custom_call.1
= control target key start
LH: loop header
LB: loop body
LE: loop exit
PB: predicated region body
PF: predicated region fallthrough
CT: control target
= control target key end

     0   :  { %s536_s0 = inlined_call_operand.hbm [shape: s32[16], index: 0, kind: input, shape index: {}]   ;;  %s537_s1 = inlined_call_operand.hbm [shape: f32[512,128], index: 1, kind: input, shape index: {}]   ;;  %s538_s2 = inlined_call_operand.hbm [shape: f32[16,128], index: 2, kind: output, shape index: {}]  }
   0x1   :  { %s281_s11 = scalar_lea.hbm %s536_s0, 16 }
   0x2   :  { %p282_p0 = scmp.ne.s32.totalorder %s536_s0, %s281_s11  ;;  %p285_p1 = scmp.lt.u32.totalorder %s281_s11, %s536_s0 }
   0x4   :  { %p287_p2 = pnand %p285_p1, %p282_p0 }
   0x6   :  { %290 = shalt.err (!%p287_p2)  }
   0x7   :  { %s391_s16 = smov [#allocation5]  }
   0x8   :  { %8 = dma.hbm_to_smem %s536_s0, 16, %s391_s16, [#allocation4] }
   0x9   :  { %363 = dma.done.wait [#allocation4], 16 }
   0xa   :  { %364 = vsyncadd [#allocation4], 4294967280 }
   0xb   :  { %10 = sfence }
   0xc   :  { %11 = vsyncpa [#allocation7], 0 }
   0xd   :  { %13 = vsyncpa [#allocation7 + $0x1], 0  ;;  %s421_s19 = smov 0   ;;  %s423_s20 = smov 0  }
   0xe   :  { %s425_s21 = smov 0  }
   0xf LB: > { %s215_s0 = sadd.s32 4294967295, %s381_s21   ;;  %s438_s22 = sadd.s32 1, %s381_s21   ;;  %s381_s21 = sphi %s425_s21, %s544_s21   ;;  %s377_s20 = sphi %s423_s20, %s543_s20   ;;  %s373_s19 = sphi %s421_s19, %s542_s19  }
  0x10   : > { %s22_s23 = ssub.s32 %s381_s21, %s438_s22  ;;  %s25_s24 = sadd.s32 1, %s377_s20 }
  0x11   : > { %p23_p3 = scmp.eq.s32.totalorder %s22_s23, 0  ;;  %p216_p4 = scmp.ne.s32.totalorder %s22_s23, 0 }
  0x12   : > { %p29_p5 = scmp.eq.s32.totalorder %s381_s21, 1  ;;  %p34_p6 = scmp.ne.s32.totalorder %s377_s20, %s373_s19 }
  0x13   : > { %s447_s25 = scalar_select %p23_p3, %s377_s20, %s25_s24  }
  0x14   : > { %p449_p7 = por %p216_p4, %p29_p5  ;;  %p35_p8 = scmp.eq.s32.totalorder %s215_s0, 1 }
  0x15   : > { %p217_p10 = scmp.ge.s32.totalorder %s381_s21, 2 }
  0x16   : > { %p453_p9 = por %p35_p8, %p34_p6  ;;  %s49_s28 = sand.u32 (!%p217_p10), 1, %s377_s20  }
  0x17   : > { %44 = sbr.rel (%p217_p10) target bundleno = 99 (0x63), region = 12  ;;  %s219_s29 = sshll.u32 (!%p217_p10), %s381_s21, 3 }
  0x18   : > { %s540_s27 = scalar_select %p453_p9, 1, 0 }
  0x19   : > { %s462_s30 = sshll.u32 (!%p217_p10), %s49_s28, 3  ;;  %s465_s4 = smov (!%p217_p10), 0  }
  0x1a   : > { %s51_s3 = scalar_lea.vmem (!%p217_p10), [#allocation6], %s462_s30 }
  0x1e LB: >> { %s59_s5 = sadd.s32 %s385_s4, %s219_s29  ;;  %s63_s7 = scalar_lea.vmem [#allocation2], %s385_s4  ;;  %s385_s4 = sphi %s465_s4, %s58_s4  }
  0x1f   : >> { %s60_s6 = sld [smem:[#allocation5 + %s59_s5]]  ;;  %s72_s8 = sshll.u32 %s63_s7, 4  ;;  %s73_s8 = int_to_ptr.vmem [resolvable:$true] %s72_s8 }
  0x20   : >> { %s64_s13 = scalar_lea.sflag [#allocation3], %s385_s4  ;;  %s293_s17 = scalar_lea.hbm %s537_s1, 8192 }
  0x25   : >> { %s220_s9 = sshll.u32 %s60_s6, 4 }
  0x26   : >> { %s62_s12 = scalar_lea.hbm %s537_s1, %s220_s9 }
  0x27   : >> { %s291_s14 = scalar_lea.hbm %s62_s12, 16  ;;  %p294_p12 = scmp.lt.u32.totalorder %s62_s12, %s537_s1 }
  0x28   : >> { %p292_p11 = scmp.ne.s32.totalorder %s62_s12, %s291_s14  ;;  %p295_p13 = scmp.lt.u32.totalorder %s293_s17, %s291_s14 }
  0x29   : >> { %p297_p1 = scmp.lt.u32.totalorder %s291_s14, %s62_s12 }
  0x2a   : >> { %p296_p0 = por %p295_p13, %p294_p12 }
  0x2c   : >> { %p298_p2 = por %p297_p1, %p296_p0 }
  0x2e   : >> { %p299_p3 = pnand %p298_p2, %p292_p11 }
  0x30   : >> { %302 = shalt.err (!%p299_p3)  }
  0x31   : >> { %s303_s23 = scalar_lea.vmem %s73_s8, 16  ;;  %s392_s24 = smov [#allocation2]  }
  0x32   : >> { %p304_p4 = scmp.ne.s32.totalorder %s73_s8, %s303_s23  ;;  %s305_s5 = sshll.u32 %s392_s24, 4  ;;  %s306_s5 = int_to_ptr.vmem [resolvable:$false] %s305_s5 }
  0x33   : >> { %s307_s6 = scalar_lea.vmem %s306_s5, 128  ;;  %p308_p5 = scmp.lt.s32.totalorder %s73_s8, %s306_s5 }
  0x34   : >> { %p309_p6 = scmp.lt.s32.totalorder %s307_s6, %s303_s23 }
  0x36   : >> { %p310_p8 = por %p309_p6, %p308_p5 }
  0x38   : >> { %p311_p10 = pnand %p310_p8, %p304_p4 }
  0x3a   : >> { %314 = shalt.err (!%p311_p10)  }
  0x3b   : >> { %75 = dma.hbm_to_vmem [thread:$0]  %s62_s12, 16, %s73_s8, %s64_s13 }
  0x3c   : >> { %s58_s4 = sadd.s32 1, %s385_s4  }
  0x3d   : >> { %p55_p9 = scmp.ge.s32.totalorder %s58_s4, 8  }
  0x3e   : > { %s387_s7 = smov (%p55_p9), 0  }
  0x3f   : > { %57 = sbr.rel (!%p55_p9) target bundleno = 30 (0x1e), region = 73 }
  0x46 LB: >> { %s82_s9 = scalar_lea.sflag [#allocation3], %s389_s7  ;;  %s389_s7 = sphi %s387_s7, %s81_s7  }
  0x47   : >> { %365 = dma.done.wait %s82_s9, 16 }
  0x48   : >> { %366 = vsyncadd %s82_s9, 4294967280  ;;  %s81_s7 = sadd.s32 1, %s389_s7  }
  0x49   : >> { %p78_p11 = scmp.ge.s32.totalorder %s81_s7, 8  }
  0x4a   : > { %v85_v0 = vld [vmem:[#allocation2] sm:$0xff] (%p78_p11)  ;;  %s222_s8 = sshll.u32 (%p78_p11), %s381_s21, 7  ;;  %s102_s11 = sshll.u32 (%p78_p11), %s51_s3, 4  ;;  %s495_s11 = int_to_ptr.vmem [resolvable:$true] %s102_s11 }
  0x4b   : > { %80 = sbr.rel (!%p78_p11) target bundleno = 70 (0x46), region = 84  ;;  %v86_v1 = vmul.f32 (%p78_p11), 11.313708, %v85_v0  ;;  %s491_s10 = scalar_lea.hbm (%p78_p11), %s538_s2, %s222_s8 }
  0x4c   : > { %s89_s12 = scalar_lea.sflag (%p78_p11), [#allocation7], %s49_s28  ;;  %s315_s13 = scalar_lea.vmem (%p78_p11), %s495_s11, 128 }
  0x4d   : > { %87 = vst [vmem:[%s51_s3] sm:$0xff] (%p78_p11), %v86_v1  ;;  %p316_p9 = scmp.ne.s32.totalorder (%p78_p11), %s495_s11, %s315_s13  ;;  %s393_s14 = smov (%p78_p11), [#allocation6]  }
  0x4e   : > { %s319_s15 = sshll.u32 (%p78_p11), %s393_s14, 4  ;;  %s320_s15 = int_to_ptr.vmem [resolvable:$false] %s319_s15 }
  0x4f   : > { %p317_p12 = pnand (%p78_p11), %p316_p9, %p449_p7  ;;  %s321_s16 = scalar_lea.vmem (%p78_p11), %s320_s15, 256 }
  0x50   : > { %p322_p0 = scmp.lt.s32.totalorder (%p78_p11), %s495_s11, %s320_s15  ;;  %p323_p1 = scmp.lt.s32.totalorder (%p78_p11), %s321_s16, %s315_s13 }
  0x51   : > { %p318_p13 = pneg (%p78_p11), %p317_p12 }
  0x52   : > { %p324_p2 = por %p323_p1, %p322_p0 }
  0x54   : > { %p325_p3 = pnand %p324_p2, %p318_p13 }
  0x56   : > { %328 = shalt.err (!%p325_p3)
}
  0x57   : > { %s329_s28 = scalar_lea.hbm %s491_s10, 128  ;;  %s333_s17 = scalar_lea.hbm %s538_s2, 256 }
  0x58   : > { %p330_p4 = scmp.ne.s32.totalorder %s491_s10, %s329_s28  ;;  %p334_p8 = scmp.lt.u32.totalorder %s491_s10, %s538_s2 }
  0x59   : > { %p335_p10 = scmp.lt.u32.totalorder %s333_s17, %s329_s28  ;;  %p337_p9 = scmp.lt.u32.totalorder %s329_s28, %s491_s10 }
  0x5a   : > { %p331_p5 = pnand %p330_p4, %p449_p7 }
  0x5b   : > { %p336_p11 = por %p335_p10, %p334_p8 }
  0x5c   : > { %p332_p6 = pneg %p331_p5 }
  0x5d   : > { %p338_p12 = por %p337_p9, %p336_p11 }
  0x5f   : > { %p339_p13 = pnand %p338_p12, %p332_p6 }
  0x61   : > { %342 = shalt.err (!%p339_p13)
}
  0x62   : > { %233 = dma.vmem_to_hbm [thread:$0]  (%p449_p7), %s495_s11, 128, %s491_s10, %s89_s12  }
  0x63 PF: > { %p239_p0 = scmp.ge.s32.totalorder %s381_s21, 1  ;;  %s114_s23 = sand.u32 1, %s373_s19  }
  0x64   : > { %p541_p1 = scmp.ne.s32.totalorder %s540_s27, 0  ;;  %s115_s24 = scalar_lea.sflag [#allocation7], %s114_s23 }
  0x66   : > { %p236_p2 = pnand %p239_p0, %p541_p1 }
  0x68   : > { %368 = dma.done.wait (!%p236_p2), %s115_s24, 128  }
  0x69   : > { %370 = vsyncadd (!%p236_p2), %s115_s24, 4294967168  ;;  %p16_p3 = scmp.ge.s32.totalorder %s438_s22, 3   ;;  %s542_s19 = smov %s377_s20 }
  0x6a   : > { %s543_s20 = smov %s447_s25  ;;  %s544_s21 = smov %s438_s22 }
  0x6b   :  { %18 = sbr.rel (!%p16_p3) target bundleno = 15 (0xf), region = 95 }
  0x72   :  { %120 = vsyncpa [#allocation7], 1 }
  0x73   :  { %122 = vsyncpa [#allocation7 + $0x1], 1 }
  0x74   :  { %123 = vsyncmov [#allocation3] }
  0x77   :  { %s124_s21 = vpop.sfrf %123 }
  0x78   :  { %p225_p7 = scmp.ne.s32.totalorder %s124_s21, 0 }
  0x7a   :  { %128 = shalt.err (%p225_p7)  }
  0x7b   :  { %130 = vsyncmov [#allocation3 + $0x1] }
  0x7e   :  { %s131_s26 = vpop.sfrf %130 }
  0x7f   :  { %p226_p4 = scmp.ne.s32.totalorder %s131_s26, 0 }
  0x81   :  { %135 = shalt.err (%p226_p4)  }
  0x82   :  { %137 = vsyncmov [#allocation3 + $0x2] }
  0x85   :  { %s138_s27 = vpop.sfrf %137 }
  0x86   :  { %p227_p5 = scmp.ne.s32.totalorder %s138_s27, 0 }
  0x88   :  { %142 = shalt.err (%p227_p5)  }
  0x89   :  { %144 = vsyncmov [#allocation3 + $0x3] }
  0x8c   :  { %s145_s5 = vpop.sfrf %144 }
  0x8d   :  { %p228_p6 = scmp.ne.s32.totalorder %s145_s5, 0 }
  0x8f   :  { %149 = shalt.err (%p228_p6)  }
  0x90   :  { %151 = vsyncmov [#allocation3 + $0x4] }
  0x93   :  { %s152_s22 = vpop.sfrf %151 }
  0x94   :  { %p229_p8 = scmp.ne.s32.totalorder %s152_s22, 0 }
  0x96   :  { %156 = shalt.err (%p229_p8)  }
  0x97   :  { %158 = vsyncmov [#allocation3 + $0x5] }
  0x9a   :  { %s159_s1 = vpop.sfrf %158 }
  0x9b   :  { %p230_p10 = scmp.ne.s32.totalorder %s159_s1, 0 }
  0x9d   :  { %163 = shalt.err (%p230_p10)  }
  0x9e   :  { %165 = vsyncmov [#allocation3 + $0x6] }
  0xa1   :  { %s166_s2 = vpop.sfrf %165 }
  0xa2   :  { %p231_p11 = scmp.ne.s32.totalorder %s166_s2, 0 }
  0xa4   :  { %170 = shalt.err (%p231_p11)  }
  0xa5   :  { %172 = vsyncmov [#allocation3 + $0x7] }
  0xa8   :  { %s173_s19 = vpop.sfrf %172 }
  0xa9   :  { %p232_p9 = scmp.ne.s32.totalorder %s173_s19, 0 }
  0xab   :  { %177 = shalt.err (%p232_p9)  }

</bundles_post_ra>
